<compile_context>
chip_gen: v7x
topology: tpu7x:2x2x1
jax: 0.10.0
libtpu: 0.0.40
codegen_flags: <defaults>
</compile_context>

<pallas_src>
import jax
import jax.numpy as jnp
from jax.experimental import pallas as pl
from jax.experimental.pallas import tpu as pltpu


def _linear_relu_kernel(x_ref, y_ref, w_ref, b_ref, o_ref):
    # One tile each: add on the VPU, tiny matmul on the MXU, bias + relu on
    # the VPU, single unmasked 128-lane store.
    z = x_ref[...] + y_ref[...]                               # [B, K]
    acc = jnp.dot(
        z, w_ref[...],
        preferred_element_type=jnp.float32,
        precision=jax.lax.Precision.HIGHEST,
    )                                                         # [B, Np]
    o_ref[...] = jnp.maximum(acc + b_ref[...], 0.0).astype(o_ref.dtype)


def _round_up(n, m):
    return ((n + m - 1) // m) * m


def make_linear_relu(w_torch, b):
    """Build the fused relu(linear(x + y)) op with padding hoisted to init.

    w_torch: [out_features, in_features]  (torch.nn.Linear.weight layout)
    b:       [out_features]
    Returns (fwd, fwd_padded):
      fwd(x, y)        -> [B, out_features]   (sliced, module semantics)
      fwd_padded(x, y) -> [B, Np]             (lane-dense padded result; the
                                               consumer may slice/mask at use)
    """
    out_f, in_f = w_torch.shape
    assert b.shape == (out_f,)
    Np = _round_up(out_f, 128)

    # One-time parameter prep: transpose + pad N with zeros (inert through
    # +b and relu in the padded columns).
    w_p = jnp.zeros((in_f, Np), w_torch.dtype).at[:, :out_f].set(w_torch.T)
    b_p = jnp.zeros((1, Np), b.dtype).at[0, :out_f].set(b)

    def fwd_padded(x, y):
        B, K = x.shape
        assert K == in_f and y.shape == (B, K)

        itemsize = jnp.dtype(x.dtype).itemsize
        # Logical-dim cost (B,K,N), not padded dims.
        cost = pl.CostEstimate(
            flops=2 * B * in_f * out_f,
            transcendentals=0,
            bytes_accessed=(2 * B * in_f + in_f * out_f + out_f + B * out_f)
            * itemsize,
        )

        return pl.pallas_call(
            _linear_relu_kernel,
            out_shape=jax.ShapeDtypeStruct((B, Np), x.dtype),
            in_specs=[
                pl.BlockSpec(memory_space=pltpu.MemorySpace.VMEM),
                pl.BlockSpec(memory_space=pltpu.MemorySpace.VMEM),
                pl.BlockSpec(memory_space=pltpu.MemorySpace.VMEM),
                pl.BlockSpec(memory_space=pltpu.MemorySpace.VMEM),
            ],
            out_specs=pl.BlockSpec(memory_space=pltpu.MemorySpace.VMEM),
            cost_estimate=cost,
        )(x, y, w_p, b_p)

    def fwd(x, y):
        # Slice at the point of use; prefer fwd_padded when the consumer can
        # fuse the slice / mask itself.
        return fwd_padded(x, y)[:, :out_f]

    return fwd, fwd_padded


if __name__ == "__main__":
    key = jax.random.PRNGKey(0)
    k_x, k_y, k_w, k_b = jax.random.split(key, 4)

    B, IN_F, OUT_F = 8, 100, 10  # Linear(100, 10)

    x = jax.random.normal(k_x, (B, IN_F), dtype=jnp.float32)
    y = jax.random.normal(k_y, (B, IN_F), dtype=jnp.float32)

    # Deterministic params mimicking nn.Linear's uniform(-1/sqrt(in), 1/sqrt(in))
    bound = 1.0 / jnp.sqrt(jnp.float32(IN_F))
    w_torch = jax.random.uniform(k_w, (OUT_F, IN_F), jnp.float32, -bound, bound)
    b = jax.random.uniform(k_b, (OUT_F,), jnp.float32, -bound, bound)

    # Padding / transpose happens once here, not per call.
    linear_relu, linear_relu_padded = make_linear_relu(w_torch, b)

    out_padded = linear_relu_padded(x, y)          # [B, 128], lane-dense
    jax.block_until_ready(out_padded)
    out = out_padded[:, :OUT_F]                    # slice at point of use

    # Cross-check against plain-JAX reference of the PyTorch forward.
    ref = jnp.maximum((x + y) @ w_torch.T + b, 0.0)
    assert out.shape == (B, OUT_F)
    assert jnp.allclose(out, ref, atol=1e-5, rtol=1e-5)

    print("KERNEL_OK")
</pallas_src>

<mosaic_0001>
module attributes {stable_mosaic.version = 11 : i64} {
  func.func @_linear_relu_kernel(%arg0: memref<8x100xf32, #tpu.memory_space<vmem>>, %arg1: memref<8x100xf32, #tpu.memory_space<vmem>>, %arg2: memref<100x128xf32, #tpu.memory_space<vmem>>, %arg3: memref<1x128xf32, #tpu.memory_space<vmem>>, %arg4: memref<8x128xf32, #tpu.memory_space<vmem>>) attributes {dimension_semantics = [], scalar_prefetch = 0 : i64, scratch_operands = 0 : i64, tpu.core_type = #tpu.core_type<tc>} {
    %c0 = arith.constant 0 : index
    %c0_0 = arith.constant 0 : index
    %0 = vector.load %arg0[%c0, %c0_0] : memref<8x100xf32, #tpu.memory_space<vmem>>, vector<8x100xf32>
    %c0_1 = arith.constant 0 : index
    %c0_2 = arith.constant 0 : index
    %1 = vector.load %arg1[%c0_1, %c0_2] : memref<8x100xf32, #tpu.memory_space<vmem>>, vector<8x100xf32>
    %2 = arith.addf %0, %1 : vector<8x100xf32>
    %c0_3 = arith.constant 0 : index
    %c0_4 = arith.constant 0 : index
    %3 = vector.load %arg2[%c0_3, %c0_4] : memref<100x128xf32, #tpu.memory_space<vmem>>, vector<100x128xf32>
    %cst = arith.constant dense<0.000000e+00> : vector<8x128xf32>
    %4 = tpu.matmul %2, %3, %cst {dimension_numbers = #tpu.dot_dimension_numbers<[1], [0], [0], [1], [0, 0, 1, 1], [], []>, precision = #tpu.contract_precision<fp32>} : vector<8x100xf32>, vector<100x128xf32>, vector<8x128xf32> -> vector<8x128xf32>
    %c0_5 = arith.constant 0 : index
    %c0_6 = arith.constant 0 : index
    %5 = vector.load %arg3[%c0_5, %c0_6] : memref<1x128xf32, #tpu.memory_space<vmem>>, vector<1x128xf32>
    %6 = vector.broadcast %5 : vector<1x128xf32> to vector<8x128xf32>
    %7 = arith.addf %4, %6 : vector<8x128xf32>
    %cst_7 = arith.constant 0.000000e+00 : f32
    %8 = vector.broadcast %cst_7 : f32 to vector<8x128xf32>
    %9 = arith.maximumf %7, %8 : vector<8x128xf32>
    %c0_8 = arith.constant 0 : index
    %c0_9 = arith.constant 0 : index
    %10 = vector.load %arg4[%c0_8, %c0_9] : memref<8x128xf32, #tpu.memory_space<vmem>>, vector<8x128xf32>
    tpu.vector_store %arg4[%c0_8, %c0_9], %9 {strides = array<i32>} : memref<8x128xf32, #tpu.memory_space<vmem>>, vector<8x128xf32>,
    return
  }
}

</mosaic_0001>

<bundles_post_ra>
// kernel: tpu_custom_call.1
= control target key start
LH: loop header
LB: loop body
LE: loop exit
PB: predicated region body
PF: predicated region fallthrough
CT: control target
= control target key end

     0   :  { %9 = vsyncpa [#allocation3], 0  ;;  %s1437_s0 = inlined_call_operand.hbm [shape: f32[8,100], index: 0, kind: input, shape index: {}]   ;;  %s1438_s1 = inlined_call_operand.hbm [shape: f32[8,100], index: 1, kind: input, shape index: {}]   ;;  %s1439_s2 = inlined_call_operand.hbm [shape: f32[100,128], index: 2, kind: input, shape index: {}]   ;;  %s1440_s3 = inlined_call_operand.vmem [shape: f32[1,128], index: 3, kind: input, shape index: {}]   ;;  %s1441_s4 = inlined_call_operand.hbm [shape: f32[8,128], index: 4, kind: output, shape index: {}]  }
   0x1   :  { %10 = vsyncpa [#allocation6], 0 }
   0x2   :  { %11 = vsyncpa [#allocation4], 0  ;;  %s1186_s15 = smov [#allocation5]   ;;  %s1187_s17 = smov [#allocation2]  }
   0x3   :  { %s28_s16 = sshll.u32 %s1186_s15, 4  ;;  %s18_s18 = sshll.u32 %s1187_s17, 4  ;;  %s29_s16 = int_to_ptr.vmem [resolvable:$true] %s28_s16  ;;  %s19_s18 = int_to_ptr.vmem [resolvable:$true] %s18_s18 }
   0x4   :  { %s1092_s21 = scalar_lea.hbm %s1438_s1, 128 }
   0x5   :  { %p1093_p0 = scmp.ne.s32.totalorder %s1438_s1, %s1092_s21  ;;  %p1096_p1 = scmp.lt.u32.totalorder %s1092_s21, %s1438_s1 }
   0x7   :  { %p1098_p2 = pnand %p1096_p1, %p1093_p0 }
   0x9   :  { %1101 = shalt.err (!%p1098_p2)
}
   0xa   :  { %s1102_s26 = scalar_lea.vmem %s29_s16, 128  ;;  %p1107_p4 = scmp.lt.s32.totalorder %s29_s16, %s29_s16 }
   0xb   :  { %p1103_p3 = scmp.ne.s32.totalorder %s29_s16, %s1102_s26  ;;  %p1108_p5 = scmp.lt.s32.totalorder %s1102_s26, %s1102_s26 }
   0xd   :  { %p1109_p6 = por %p1108_p5, %p1107_p4 }
   0xf   :  { %p1110_p7 = pnand %p1109_p6, %p1103_p3 }
  0x11   :  { %1113 = shalt.err (!%p1110_p7)
}
  0x12   :  { %31 = dma.hbm_to_vmem [thread:$0]  %s1438_s1, 128, %s29_s16, [#allocation6]  }
  0x13   :  { %s1114_s5 = scalar_lea.hbm %s1437_s0, 128 }
  0x14   :  { %p1115_p8 = scmp.ne.s32.totalorder %s1437_s0, %s1114_s5  ;;  %p1118_p9 = scmp.lt.u32.totalorder %s1114_s5, %s1437_s0 }
  0x16   :  { %p1120_p10 = pnand %p1118_p9, %p1115_p8 }
  0x18   :  { %1123 = shalt.err (!%p1120_p10)
}
  0x19   :  { %s1124_s10 = scalar_lea.vmem %s19_s18, 128  ;;  %p1129_p12 = scmp.lt.s32.totalorder %s19_s18, %s19_s18 }
  0x1a   :  { %p1125_p11 = scmp.ne.s32.totalorder %s19_s18, %s1124_s10  ;;  %p1130_p13 = scmp.lt.s32.totalorder %s1124_s10, %s1124_s10 }
  0x1c   :  { %p1131_p0 = por %p1130_p13, %p1129_p12 }
  0x1e   :  { %p1132_p1 = pnand %p1131_p0, %p1125_p11 }
  0x20   :  { %1135 = shalt.err (!%p1132_p1)
}
  0x21   :  { %21 = dma.hbm_to_vmem [thread:$0]  %s1437_s0, 128, %s19_s18, [#allocation3]  }
  0x22   :  { %s1188_s12 = smov [#allocation7]   ;;  %s1136_s16 = scalar_lea.hbm %s1439_s2, 1664 }
  0x23   :  { %s37_s13 = sshll.u32 %s1188_s12, 4  ;;  %p1137_p2 = scmp.ne.s32.totalorder %s1439_s2, %s1136_s16  ;;  %s38_s13 = int_to_ptr.vmem [resolvable:$true] %s37_s13 }
  0x24   :  { %p1140_p3 = scmp.lt.u32.totalorder %s1136_s16, %s1439_s2 }
  0x26   :  { %p1142_p4 = pnand %p1140_p3, %p1137_p2 }
  0x28   :  { %1145 = shalt.err (!%p1142_p4)
}
  0x29   :  { %s1146_s22 = scalar_lea.vmem %s38_s13, 1664  ;;  %p1151_p6 = scmp.lt.s32.totalorder %s38_s13, %s38_s13 }
  0x2a   :  { %p1147_p5 = scmp.ne.s32.totalorder %s38_s13, %s1146_s22  ;;  %p1152_p7 = scmp.lt.s32.totalorder %s1146_s22, %s1146_s22 }
  0x2c   :  { %p1153_p8 = por %p1152_p7, %p1151_p6 }
  0x2e   :  { %p1154_p9 = pnand %p1153_p8, %p1147_p5 }
  0x30   :  { %1157 = shalt.err (!%p1154_p9)
}
  0x31   :  { %s1189_s0 = smov 128   ;;  %s1190_s18 = smov 8  }
  0x32   :  { %43 = dma.hbm_to_vmem [thread:$0]  %s1439_s2, 1664, %s38_s13, [#allocation6], %s1189_s0, %s1189_s0, %s1190_s18  }
  0x33   :  { %1180 = dma.done.wait [#allocation3], 128  }
  0x34   :  { %1181 = vsyncadd [#allocation3], 4294967168 }
  0x35   :  { %1182 = dma.done.wait [#allocation6], 1792  }
  0x36   :  { %1183 = vsyncadd [#allocation6], 4294965504  ;;  %v1191_v0 = vmov 0.0|0.0   ;;  %vm1192_vm0 = vmmov 0   ;;  %v1193_v1 = vmov 0.0   ;;  %v58_v2 = vld [vmem:[#allocation7] sm:$0xff] }
  0x37   :  { %965 = vmatprep.subr.bf16.mxu1 %v1191_v0  ;;  %1019 = vmatprep.subr.bf16.mxu0 %v1191_v0  ;;  %v59_v3 = vld [vmem:[#allocation7 + $0x8] sm:$0xff]  ;;  %v60_v4 = vld [vmem:[#allocation7 + $0x10] sm:$0xff]  ;;  %v87_v5 = vand.u32 4294901760, %v58_v2  ;;  %v61_v7 = vld [vmem:[#allocation7 + $0x18] sm:$0xff]  ;;  %vm78_vm1 = vcmask 818176   ;;  %vm82_vm2 = vcmask 1043456  }
  0x38   :  { %817 = vmatprep.mubr.msk.f32.mxu1 %vm1192_vm0, %v1193_v1  ;;  %904 = vmatprep.mubr.msk.f32.mxu0 %vm1192_vm0, %v1193_v1  ;;  %v90_v6 = vand.u32 4294901760, %v59_v3  ;;  %v93_v8 = vand.u32 4294901760, %v60_v4  ;;  %v96_v9 = vand.u32 4294901760, %v61_v7  ;;  %v62_v10 = vld [vmem:[#allocation7 + $0x20] sm:$0xff]  ;;  %v63_v11 = vld [vmem:[#allocation7 + $0x28] sm:$0xff]  ;;  %v64_v16 = vld [vmem:[#allocation7 + $0x30] sm:$0xff] }
  0x39   :  { %v99_v14 = vand.u32 4294901760, %v62_v10  ;;  %v102_v15 = vand.u32 4294901760, %v63_v11  ;;  %v65_v17 = vld [vmem:[#allocation7 + $0x38] sm:$0xff]  ;;  %v55_v18 = vld [vmem:[#allocation2] sm:$0xff]  ;;  %v105_v21 = vand.u32 4294901760, %v64_v16  ;;  %v66_v24 = vld [vmem:[#allocation7 + $0x40] sm:$0xff]  ;;  %v1276_v27 = vsub.f32 %v58_v2, %v87_v5 }
  0x3a   :  { %v1262_v12 = vpack.c.bf16 %v90_v6, %v87_v5  ;;  %v1266_v13 = vpack.c.bf16 %v96_v9, %v93_v8  ;;  %v56_v19 = vld [vmem:[#allocation5] sm:$0xff]  ;;  %v108_v22 = vand.u32 4294901760, %v65_v17  ;;  %v67_v25 = vld [vmem:[#allocation7 + $0x48] sm:$0xff]  ;;  %v1278_v28 = vsub.f32 %v59_v3, %v90_v6  ;;  %v68_v33 = vld [vmem:[#allocation7 + $0x50] sm:$0xff]  ;;  %s1194_s26 = smov [#allocation8]  }
  0x3b   :  { %v1272_v20 = vpack.c.bf16 %v102_v15, %v99_v14  ;;  %v57_v23 = vadd.f32 %v56_v19, %v55_v18  ;;  %v111_v31 = vand.u32 4294901760, %v66_v24  ;;  %v114_v32 = vand.u32 4294901760, %v67_v25  ;;  %v69_v34 = vld [vmem:[#allocation7 + $0x58] sm:$0xff]  ;;  %v70_v45 = vld [vmem:[#allocation7 + $0x60] sm:$0xf]  ;;  %s696_s27 = sshll.u32 %s1194_s26, 4  ;;  %s697_s27 = int_to_ptr.vmem [resolvable:$true] %s696_s27 }
  0x3c   :  { %967 = vmatpush3.bf16.msra.mxu1 %v1262_v12  ;;  %1021 = vmatpush3.bf16.msra.mxu0 %v1262_v12  ;;  %v1284_v30 = vpack.c.bf16 %v108_v22, %v105_v21  ;;  %v1291_v36 = vsub.f32 %v60_v4, %v93_v8  ;;  %v1293_v37 = vsub.f32 %v61_v7, %v96_v9  ;;  %v177_v38 = vand.u32 4294901760, %v1276_v27  ;;  %s1158_s28 = scalar_lea.vmem %s697_s27, 128  ;;  %p1163_p11 = scmp.lt.s32.totalorder %s697_s27, %s697_s27 }
  0x3d   :  { %968 = vmatprep.subr.bf16.mxu1 %v1191_v0  ;;  %1022 = vmatprep.subr.bf16.mxu0 %v1191_v0  ;;  %v80_v26 = vsel %vm78_vm1, %v57_v23, 0  ;;  %v184_v39 = vand.u32 4294901760, %v1278_v28  ;;  %v1299_v40 = vpack.c.bf16 %v114_v32, %v111_v31  ;;  %v117_v41 = vand.u32 4294901760, %v68_v33  ;;  %p1159_p10 = scmp.ne.s32.totalorder %s697_s27, %s1158_s28  ;;  %p1164_p12 = scmp.lt.s32.totalorder %s1158_s28, %s1158_s28 }
  0x3e   :  { %v1280_v29 = vand.u32 4294901760, %v80_v26  ;;  %v120_v42 = vand.u32 4294901760, %v69_v34  ;;  %v1303_v43 = vsub.f32 %v62_v10, %v99_v14  ;;  %v1305_v44 = vsub.f32 %v63_v11, %v102_v15 }
  0x3f   :  { %v178_v47 = vsub.f32 %v1276_v27, %v177_v38  ;;  %v185_v48 = vsub.f32 %v1278_v28, %v184_v39  ;;  %v191_v49 = vand.u32 4294901760, %v1291_v36  ;;  %v198_v50 = vand.u32 4294901760, %v1293_v37  ;;  %p1165_p13 = por %p1164_p12, %p1163_p11 }
  0x40   :  { %970 = vmatpush3.bf16.msra.mxu1 %v1266_v13  ;;  %1024 = vmatpush3.bf16.msra.mxu0 %v1266_v13  ;;  %v1289_v35 = vsub.f32 %v80_v26, %v1280_v29  ;;  %v1314_v51 = vpack.c.bf16 %v120_v42, %v117_v41  ;;  %v1316_v52 = vsub.f32 %v64_v16, %v105_v21  ;;  %v84_v53 = vsel %vm82_vm2, %v70_v45, 0 }
  0x41   :  { %971 = vmatprep.subr.bf16.mxu1 %v1191_v0  ;;  %1025 = vmatprep.subr.bf16.mxu0 %v1191_v0  ;;  %v1320_v54 = vsub.f32 %v65_v17, %v108_v22  ;;  %v205_v56 = vand.u32 4294901760, %v1303_v43  ;;  %v212_v57 = vand.u32 4294901760, %v1305_v44  ;;  %v179_v58 = vand.u32 4294901760, %v178_v47  ;;  %p1166_p0 = pnand %p1165_p13, %p1159_p10 }
  0x42   :  { %v166_v46 = vand.u32 4294901760, %v1289_v35  ;;  %v186_v59 = vand.u32 4294901760, %v185_v48  ;;  %v192_v60 = vsub.f32 %v1291_v36, %v191_v49  ;;  %v199_v61 = vsub.f32 %v1293_v37, %v198_v50 }
  0x43   :  { %v1329_v62 = vand.u32 4294901760, %v84_v53  ;;  %v1331_v63 = vsub.f32 %v66_v24, %v111_v31  ;;  %v1333_v2 = vsub.f32 %v67_v25, %v114_v32  ;;  %v1038_v3 = vpack.c.bf16 %v184_v39, %v177_v38 }
  0x44   :  { %973 = vmatpush3.bf16.msra.mxu1 %v1272_v20  ;;  %1027 = vmatpush3.bf16.msra.mxu0 %v1272_v20  ;;  %v167_v55 = vsub.f32 %v1289_v35, %v166_v46  ;;  %v206_v5 = vsub.f32 %v1303_v43, %v205_v56  ;;  %v213_v6 = vsub.f32 %v1305_v44, %v212_v57  ;;  %v219_v7 = vand.u32 4294901760, %v1316_v52 }
  0x45   :  { %974 = vmatprep.subr.bf16.mxu1 %v1191_v0  ;;  %1028 = vmatprep.subr.bf16.mxu0 %v1191_v0  ;;  %v984_v8 = vpack.c.bf16 %v186_v59, %v179_v58  ;;  %v193_v9 = vand.u32 4294901760, %v192_v60  ;;  %v200_v10 = vand.u32 4294901760, %v199_v61  ;;  %v226_v11 = vand.u32 4294901760, %v1320_v54 }
  0x46   :  { %v168_v4 = vand.u32 4294901760, %v167_v55  ;;  %v1343_v14 = vsub.f32 %v68_v33, %v117_v41  ;;  %v1345_v15 = vsub.f32 %v69_v34, %v120_v42  ;;  %v1041_v16 = vpack.c.bf16 %v198_v50, %v191_v49 }
  0x47   :  { %v207_v17 = vand.u32 4294901760, %v206_v5  ;;  %v214_v18 = vand.u32 4294901760, %v213_v6  ;;  %v220_v19 = vsub.f32 %v1316_v52, %v219_v7  ;;  %v987_v21 = vpack.c.bf16 %v200_v10, %v193_v9 }
  0x48   :  { %976 = vmatpush3.bf16.msra.mxu1 %v1284_v30  ;;  %1030 = vmatpush3.bf16.msra.mxu0 %v1284_v30  ;;  %v227_v22 = vsub.f32 %v1320_v54, %v226_v11  ;;  %v233_v23 = vand.u32 4294901760, %v1331_v63  ;;  %v240_v24 = vand.u32 4294901760, %v1333_v2  ;;  %v1044_v26 = vpack.c.bf16 %v212_v57, %v205_v56 }
  0x49   :  { %977 = vmatprep.subr.bf16.mxu1 %v1191_v0  ;;  %1031 = vmatprep.subr.bf16.mxu0 %v1191_v0  ;;  %v990_v25 = vpack.c.bf16 %v214_v18, %v207_v17  ;;  %v221_v31 = vand.u32 4294901760, %v220_v19  ;;  %v247_v32 = vand.u32 4294901760, %v1343_v14  ;;  %v254_v39 = vand.u32 4294901760, %v1345_v15 }
  0x4a   :  { %v228_v33 = vand.u32 4294901760, %v227_v22  ;;  %v234_v34 = vsub.f32 %v1331_v63, %v233_v23  ;;  %v241_v38 = vsub.f32 %v1333_v2, %v240_v24  ;;  %v1366_v41 = vsub.f32 %v84_v53, %v1329_v62 }
  0x4b   :  { %v1047_v42 = vpack.c.bf16 %v226_v11, %v219_v7  ;;  %v248_v45 = vsub.f32 %v1343_v14, %v247_v32  ;;  %v255_v49 = vsub.f32 %v1345_v15, %v254_v39  ;;  %v1050_v50 = vpack.c.bf16 %v240_v24, %v233_v23 }
  0x4c   :  { %979 = vmatpush3.bf16.msra.mxu1 %v1299_v40  ;;  %1033 = vmatpush3.bf16.msra.mxu0 %v1299_v40  ;;  %v235_v47 = vand.u32 4294901760, %v234_v34  ;;  %v242_v48 = vand.u32 4294901760, %v241_v38  ;;  %v261_v57 = vand.u32 4294901760, %v1366_v41  ;;  %v1053_v59 = vpack.c.bf16 %v254_v39, %v247_v32 }
  0x4d   :  { %980 = vmatprep.subr.bf16.mxu1 %v1191_v0  ;;  %1034 = vmatprep.subr.bf16.mxu0 %v1191_v0  ;;  %v249_v53 = vand.u32 4294901760, %v248_v45  ;;  %v256_v56 = vand.u32 4294901760, %v255_v49 }
  0x4e   :  { %v996_v55 = vpack.c.bf16 %v242_v48, %v235_v47  ;;  %v262_v60 = vsub.f32 %v1366_v41, %v261_v57 }
  0x4f   :  { %v999_v58 = vpack.c.bf16 %v256_v56, %v249_v53 }
  0x50   :  { %982 = vmatpush3.bf16.msra.mxu1 %v1314_v51  ;;  %1036 = vmatpush3.bf16.msra.mxu0 %v1314_v51  ;;  %v263_v61 = vand.u32 4294901760, %v262_v60 }
  0x51   :  { %815 = vmatprep.subr.mxu1 %v1193_v1  ;;  %902 = vmatprep.subr.mxu0 %v1193_v1 }
  0x54   :  { %816 = vmatpush3.msra.mxu1 %v1329_v62  ;;  %903 = vmatpush3.msra.mxu0 %v1329_v62 }
  0x55   :  { %983 = vmatprep.subr.bf16.mxu1 %v1191_v0  ;;  %1037 = vmatprep.subr.bf16.mxu0 %v1191_v0 }
  0x56   :  { %818 = vmatmul.mubr.f32.vlgmr.msra.gmra.mrb[0].mxu1 %v168_v4  ;;  %905 = vmatmul.mubr.f32.vlgmr.msra.gmra.mrb[0].mxu0 %v166_v46  ;;  %v993_v46 = vpack.c.bf16 %v228_v33, %v221_v31  ;;  %v1005_v4 = vpack.c.bf16 %v1293_v37, %v1291_v36 }
  0x57   :  { %985 = vmatpush3.bf16.msra.mxu1 %v984_v8  ;;  %1039 = vmatpush3.bf16.msra.mxu0 %v1038_v3  ;;  %v1002_v3 = vpack.c.bf16 %v1278_v28, %v1276_v27  ;;  %v1008_v27 = vpack.c.bf16 %v1305_v44, %v1303_v43  ;;  %v706_v28 = vld [vmem:[%s1440_s3] ss:$0 sm:$0xff] }
  0x58   :  { %986 = vmatprep.subr.bf16.mxu1 %v1191_v0  ;;  %1040 = vmatprep.subr.bf16.mxu0 %v1191_v0 }
  0x59   :  { %846 = vmatprep.mubr.msk.f32.mxu1 %vm1192_vm0, %v1193_v1  ;;  %933 = vmatprep.mubr.msk.f32.mxu0 %vm1192_vm0, %v1193_v1 }
  0x5b   :  { %988 = vmatpush3.bf16.msra.mxu1 %v987_v21  ;;  %1042 = vmatpush3.bf16.msra.mxu0 %v1041_v16 }
  0x5c   :  { %989 = vmatprep.subr.bf16.mxu1 %v1191_v0  ;;  %1043 = vmatprep.subr.bf16.mxu0 %v1191_v0 }
  0x5f   :  { %991 = vmatpush3.bf16.msra.mxu1 %v990_v25  ;;  %1045 = vmatpush3.bf16.msra.mxu0 %v1044_v26 }
  0x60   :  { %992 = vmatprep.subr.bf16.mxu1 %v1191_v0  ;;  %1046 = vmatprep.subr.bf16.mxu0 %v1191_v0 }
  0x63   :  { %994 = vmatpush3.bf16.msra.mxu1 %v993_v46  ;;  %1048 = vmatpush3.bf16.msra.mxu0 %v1047_v42 }
  0x64   :  { %995 = vmatprep.subr.bf16.mxu1 %v1191_v0  ;;  %1049 = vmatprep.subr.bf16.mxu0 %v1191_v0 }
  0x67   :  { %997 = vmatpush3.bf16.msra.mxu1 %v996_v55  ;;  %1051 = vmatpush3.bf16.msra.mxu0 %v1050_v50 }
  0x68   :  { %998 = vmatprep.subr.bf16.mxu1 %v1191_v0  ;;  %1052 = vmatprep.subr.bf16.mxu0 %v1191_v0 }
  0x6b   :  { %1000 = vmatpush3.bf16.msra.mxu1 %v999_v58  ;;  %1054 = vmatpush3.bf16.msra.mxu0 %v1053_v59 }
  0x6c   :  { %844 = vmatprep.subr.mxu1 %v1193_v1  ;;  %931 = vmatprep.subr.mxu0 %v1193_v1 }
  0x6f   :  { %845 = vmatpush3.msra.mxu1 %v263_v61  ;;  %932 = vmatpush3.msra.mxu0 %v261_v57 }
  0x70   :  { %1001 = vmatprep.subr.bf16.mxu1 %v1191_v0  ;;  %1055 = vmatprep.subr.bf16.mxu0 %v1191_v0 }
  0x71   :  { %847 = vmatmul.mubr.f32.vlgmr.msra.gmra.mrb[0].mxu1 %v1280_v29  ;;  %934 = vmatmul.mubr.f32.vlgmr.msra.gmra.mrb[0].mxu0 %v1280_v29 }
  0x72   :  { %1003 = vmatpush3.bf16.msra.mxu1 %v1002_v3  ;;  %1057 = vmatpush3.bf16.msra.mxu0 %v1262_v12  ;;  %v1011_v12 = vpack.c.bf16 %v1320_v54, %v1316_v52 }
  0x73   :  { %1004 = vmatprep.subr.bf16.mxu1 %v1191_v0  ;;  %1058 = vmatprep.subr.bf16.mxu0 %v1191_v0 }
  0x74   :  { %875 = vmatprep.mubr.msk.f32.mxu1 %vm1192_vm0, %v1193_v1  ;;  %962 = vmatprep.mubr.msk.f32.mxu0 %vm1192_vm0, %v1193_v1 }
  0x76   :  { %1006 = vmatpush3.bf16.msra.mxu1 %v1005_v4  ;;  %1060 = vmatpush3.bf16.msra.mxu0 %v1266_v13  ;;  %v1014_v13 = vpack.c.bf16 %v1333_v2, %v1331_v63 }
  0x77   :  { %1007 = vmatprep.subr.bf16.mxu1 %v1191_v0  ;;  %1061 = vmatprep.subr.bf16.mxu0 %v1191_v0 }
  0x7a   :  { %1009 = vmatpush3.bf16.msra.mxu1 %v1008_v27  ;;  %1063 = vmatpush3.bf16.msra.mxu0 %v1272_v20  ;;  %v1017_v20 = vpack.c.bf16 %v1345_v15, %v1343_v14 }
  0x7b   :  { %1010 = vmatprep.subr.bf16.mxu1 %v1191_v0  ;;  %1064 = vmatprep.subr.bf16.mxu0 %v1191_v0 }
  0x7e   :  { %1012 = vmatpush3.bf16.msra.mxu1 %v1011_v12  ;;  %1066 = vmatpush3.bf16.msra.mxu0 %v1284_v30 }
  0x7f   :  { %1013 = vmatprep.subr.bf16.mxu1 %v1191_v0  ;;  %1067 = vmatprep.subr.bf16.mxu0 %v1191_v0 }
  0x82   :  { %1015 = vmatpush3.bf16.msra.mxu1 %v1014_v13  ;;  %1069 = vmatpush3.bf16.msra.mxu0 %v1299_v40 }
  0x83   :  { %1016 = vmatprep.subr.bf16.mxu1 %v1191_v0  ;;  %1070 = vmatprep.subr.bf16.mxu0 %v1191_v0 }
  0x86   :  { %1018 = vmatpush3.bf16.msra.mxu1 %v1017_v20  ;;  %1072 = vmatpush3.bf16.msra.mxu0 %v1314_v51 }
  0x87   :  { %873 = vmatprep.subr.mxu1 %v1193_v1  ;;  %960 = vmatprep.subr.mxu0 %v1193_v1 }
  0x8a   :  { %874 = vmatpush3.msra.mxu1 %v1366_v41  ;;  %961 = vmatpush3.msra.mxu0 %v1329_v62 }
  0x8b   :  { %876 = vmatmul.mubr.f32.vlgmr.msra.gmra.mrb[0].mxu1 %v1289_v35  ;;  %963 = vmatmul.mubr.f32.vlgmr.msra.gmra.mrb[0].mxu0 %v1280_v29 }
 0x15e   :  { %v404_v0 = vpop.f32.mrb[0].mxu1  ;;  %v684_v30 = vpop.f32.mrb[0].mxu0 }
 0x15f   :  { %v1073_v36 = vadd.f32 %v706_v28, %v404_v0  ;;  %v877_v37 = vpop.f32.mrb[1].mxu1  ;;  %v964_v40 = vpop.f32.mrb[1].mxu0 }
 0x161   :  { %v1074_v1 = vadd.f32 %v1073_v36, %v684_v30 }
 0x163   :  { %v688_v43 = vmax.f32 %v1074_v1, 0.0 }
 0x165   :  { %689 = vst [vmem:[#allocation8] sm:$0xff] %v688_v43 }
 0x166   :  { %1169 = shalt.err (!%p1166_p0)
}
 0x167   :  { %s1170_s30 = scalar_lea.hbm %s1441_s4, 128 }
 0x168   :  { %p1171_p1 = scmp.ne.s32.totalorder %s1441_s4, %s1170_s30  ;;  %p1174_p2 = scmp.lt.u32.totalorder %s1170_s30, %s1441_s4 }
 0x16a   :  { %p1176_p3 = pnand %p1174_p2, %p1171_p1 }
 0x16c   :  { %1179 = shalt.err (!%p1176_p3)
}
 0x16d   :  { %699 = dma.vmem_to_hbm [thread:$0]  %s697_s27, 128, %s1441_s4, [#allocation4]  }
 0x16e   :  { %1184 = dma.done.wait [#allocation4], 128  }
 0x16f   :  { %1185 = vsyncadd [#allocation4], 4294967168 }
 0x170   :  { %703 = vsyncpa [#allocation3], 1 }
 0x171   :  { %704 = vsyncpa [#allocation6], 1 }
 0x172   :  { %705 = vsyncpa [#allocation4], 1 }

</bundles_post_ra>
